<compile_context>
chip_gen: v5e
topology: v5e:2x2
jax: 0.10.0
libtpu: 0.0.40
codegen_flags: <defaults>
</compile_context>

<pallas_src>
import functools

import jax
import jax.numpy as jnp
from jax.experimental import pallas as pl
from jax.experimental.pallas import tpu as pltpu


def _cdiv(a, b):
    return -(-a // b)


def _deconv_tanh_kernel(wb_ref, x_ref, o_ref, *, cin, cout, k, wp, chan, pout):
    # wb_ref : SMEM f32[cout*cin*k*k + cout]  flipped conv taps (co-major) then bias
    # x_ref  : VMEM f32[nb, wflat]            dilated+padded input, one flat row / image
    # o_ref  : VMEM f32[nb, cout, pout]       lane-dense output rows (pout = rup(ho*wp,128))
    x = x_ref[...]
    nb = x.shape[0]
    ntaps = cin * k * k

    # accumulators start at the bias (scalar broadcast from SMEM)
    accs = [jnp.zeros((nb, pout), jnp.float32) + wb_ref[cout * ntaps + co]
            for co in range(cout)]

    # 18 shifted views of the flattened dilated input; each is reused by every cout.
    t = 0
    for ci in range(cin):
        for kh in range(k):
            for kw in range(k):
                base = ci * chan + kh * wp + kw
                plane = x[:, base:base + pout]        # static lane slice (XLU shift)
                for co in range(cout):
                    accs[co] = accs[co] + wb_ref[co * ntaps + t] * plane
                t += 1

    for co in range(cout):
        o_ref[:, co, :] = jnp.tanh(accs[co])


@functools.partial(jax.jit, static_argnames=("stride", "padding", "images_per_block"))
def conv_transpose2d_tanh(x, weight, bias, *, stride=2, padding=1, images_per_block=32):
    """x: (N, Cin, H, W); weight: (Cin, Cout, K, K) (PyTorch ConvTranspose2d layout);
    bias: (Cout,). Returns tanh(conv_transpose2d(x)) of shape (N, Cout, Ho, Wo)."""
    n, cin, h, w = x.shape
    cout = weight.shape[1]
    k = weight.shape[2]
    ho = (h - 1) * stride - 2 * padding + k
    wo = (w - 1) * stride - 2 * padding + k
    pad = k - 1 - padding
    assert pad >= 0, "wrapper assumes padding <= kernel_size - 1 and output_padding == 0"

    hp = (h - 1) * stride + 1 + 2 * pad          # dilated + edge-padded height
    wp = (w - 1) * stride + 1 + 2 * pad          # dilated + edge-padded width
    chan = hp * wp

    # Batch blocking: big blocks amortize per-grid-step overhead, but keep >= 2 grid
    # steps when n > 1 so the "parallel" axis can shard across both v7x TensorCores.
    nb = max(1, min(images_per_block, n))
    if n > 1:
        nb = min(nb, _cdiv(n, 2))
    g = _cdiv(n, nb)
    n_pad = g * nb

    # Lane-dense row widths.  Output rows live in "padded-width" coordinates
    # (index = oh*wp + ow), so every tap is a pure lane shift of the input row.
    pout = _cdiv(ho * wp, 128) * 128
    max_end = (cin - 1) * chan + (k - 1) * wp + (k - 1) + pout
    wflat = _cdiv(max_end, 128) * 128

    # --- tiny pre-kernel glue: dilate (interior pad), edge pad, flatten, lane pad.
    x_dp = jax.lax.pad(x.astype(jnp.float32), jnp.float32(0.0),
                       ((0, n_pad - n, 0), (0, 0, 0),
                        (pad, pad, stride - 1), (pad, pad, stride - 1)))  # (n_pad,cin,hp,wp)
    x_rows = x_dp.reshape(n_pad, cin * chan)
    x_rows = jnp.pad(x_rows, ((0, 0), (0, wflat - cin * chan)))
    x_blocks = x_rows.reshape(g, nb, wflat)

    # Flipped / channel-transposed taps (co-major), then bias -> one small SMEM table.
    w_flip = jnp.transpose(weight[:, :, ::-1, ::-1], (1, 0, 2, 3)).astype(jnp.float32)
    wb_flat = jnp.concatenate([w_flip.reshape(-1), bias.astype(jnp.float32).reshape(-1)])

    out = pl.pallas_call(
        functools.partial(_deconv_tanh_kernel, cin=cin, cout=cout, k=k,
                          wp=wp, chan=chan, pout=pout),
        out_shape=jax.ShapeDtypeStruct((g, nb, cout, pout), jnp.float32),
        grid=(g,),
        in_specs=[
            pl.BlockSpec(memory_space=pltpu.MemorySpace.SMEM),
            pl.BlockSpec((pl.Squeezed(), nb, wflat), lambda i: (i, 0, 0)),
        ],
        out_specs=pl.BlockSpec((pl.Squeezed(), nb, cout, pout), lambda i: (i, 0, 0, 0)),
        compiler_params=pltpu.CompilerParams(dimension_semantics=("parallel",)),
    )(wb_flat, x_blocks)

    # Unpack: slice + reshape only (no transpose).  Rows are in padded-width coords,
    # so drop the pout padding, reshape to (ho, wp) and slice the wo valid columns.
    y = out.reshape(n_pad, cout, pout)[:n, :, :ho * wp]
    return y.reshape(n, cout, ho, wp)[:, :, :, :wo]


def _reference(x, weight, bias, *, stride=2, padding=1):
    k = weight.shape[2]
    w_conv = jnp.transpose(weight[:, :, ::-1, ::-1], (1, 0, 2, 3)).astype(jnp.float32)
    pad = k - 1 - padding
    y = jax.lax.conv_general_dilated(
        x.astype(jnp.float32), w_conv, window_strides=(1, 1),
        padding=[(pad, pad), (pad, pad)],
        lhs_dilation=(stride, stride),
        dimension_numbers=("NCHW", "OIHW", "NCHW"),
        precision=jax.lax.Precision.HIGHEST)
    return jnp.tanh(y + bias[None, :, None, None])


if __name__ == "__main__":
    key = jax.random.PRNGKey(0)
    kx, kw_, kb = jax.random.split(key, 3)

    # x1 ~ torch.randn(1, 2, 9, 9)
    x1 = jax.random.normal(kx, (1, 2, 9, 9), dtype=jnp.float32)
    # ConvTranspose2d(2, 3, 3, 2, 1): weight (in=2, out=3, 3, 3), bias (3,)
    fan_in = 3 * 3 * 3  # out_channels * k * k (PyTorch convention for ConvTranspose)
    bound = 1.0 / float(jnp.sqrt(fan_in))
    weight = jax.random.uniform(kw_, (2, 3, 3, 3), jnp.float32, -bound, bound)
    bias = jax.random.uniform(kb, (3,), jnp.float32, -bound, bound)

    out = jax.block_until_ready(conv_transpose2d_tanh(x1, weight, bias))
    assert out.shape == (1, 3, 17, 17), out.shape
    ref = jax.block_until_ready(_reference(x1, weight, bias))
    assert jnp.allclose(out, ref, atol=1e-5, rtol=1e-5), float(jnp.max(jnp.abs(out - ref)))

    # batched check: exercises the multi-step grid (nb=ceil(5/2)=3, g=2) + batch padding
    x5 = jax.random.normal(jax.random.PRNGKey(1), (5, 2, 9, 9), dtype=jnp.float32)
    out5 = jax.block_until_ready(conv_transpose2d_tanh(x5, weight, bias))
    ref5 = jax.block_until_ready(_reference(x5, weight, bias))
    assert out5.shape == (5, 3, 17, 17), out5.shape
    assert jnp.allclose(out5, ref5, atol=1e-5, rtol=1e-5), float(jnp.max(jnp.abs(out5 - ref5)))

    print("KERNEL_OK")
</pallas_src>

<mosaic_0001>
module attributes {stable_mosaic.version = 11 : i64} {
  func.func @_deconv_tanh_kernel(%arg0: i32, %arg1: memref<57xf32, #tpu.memory_space<smem>>, %arg2: memref<1x1x896xf32, #tpu.memory_space<vmem>>, %arg3: memref<1x1x3x384xf32, #tpu.memory_space<vmem>>) attributes {dimension_semantics = [#tpu.dimension_semantics<parallel>], iteration_bounds = array<i64: 1>, scalar_prefetch = 0 : i64, scratch_operands = 0 : i64, tpu.core_type = #tpu.core_type<tc>, window_params = [{transform_indices = @transform_0, window_bounds = array<i64: 57>}, {transform_indices = @transform_1, window_bounds = array<i64: 1, 1, 896>}, {transform_indices = @transform_2, window_bounds = array<i64: 1, 1, 3, 384>}]} {
    %c0 = arith.constant 0 : index
    %c0_0 = arith.constant 0 : index
    %c0_1 = arith.constant 0 : index
    %0 = vector.load %arg2[%c0, %c0_0, %c0_1] : memref<1x1x896xf32, #tpu.memory_space<vmem>>, vector<1x1x896xf32>
    %1 = vector.shape_cast %0 : vector<1x1x896xf32> to vector<1x896xf32>
    %cst = arith.constant 0.000000e+00 : f32
    %2 = vector.broadcast %cst : f32 to vector<1x384xf32>
    %c54 = arith.constant 54 : index
    %3 = memref.load %arg1[%c54] : memref<57xf32, #tpu.memory_space<smem>>
    %4 = vector.broadcast %3 : f32 to vector<1x384xf32>
    %5 = arith.addf %2, %4 : vector<1x384xf32>
    %cst_2 = arith.constant 0.000000e+00 : f32
    %6 = vector.broadcast %cst_2 : f32 to vector<1x384xf32>
    %c55 = arith.constant 55 : index
    %7 = memref.load %arg1[%c55] : memref<57xf32, #tpu.memory_space<smem>>
    %8 = vector.broadcast %7 : f32 to vector<1x384xf32>
    %9 = arith.addf %6, %8 : vector<1x384xf32>
    %cst_3 = arith.constant 0.000000e+00 : f32
    %10 = vector.broadcast %cst_3 : f32 to vector<1x384xf32>
    %c56 = arith.constant 56 : index
    %11 = memref.load %arg1[%c56] : memref<57xf32, #tpu.memory_space<smem>>
    %12 = vector.broadcast %11 : f32 to vector<1x384xf32>
    %13 = arith.addf %10, %12 : vector<1x384xf32>
    %14 = vector.extract_strided_slice %1 {offsets = [0, 0], sizes = [1, 384], strides = [1, 1]} : vector<1x896xf32> to vector<1x384xf32>
    %c0_4 = arith.constant 0 : index
    %15 = memref.load %arg1[%c0_4] : memref<57xf32, #tpu.memory_space<smem>>
    %16 = vector.broadcast %15 : f32 to vector<1x384xf32>
    %17 = arith.mulf %16, %14 : vector<1x384xf32>
    %18 = arith.addf %5, %17 : vector<1x384xf32>
    %c18 = arith.constant 18 : index
    %19 = memref.load %arg1[%c18] : memref<57xf32, #tpu.memory_space<smem>>
    %20 = vector.broadcast %19 : f32 to vector<1x384xf32>
    %21 = arith.mulf %20, %14 : vector<1x384xf32>
    %22 = arith.addf %9, %21 : vector<1x384xf32>
    %c36 = arith.constant 36 : index
    %23 = memref.load %arg1[%c36] : memref<57xf32, #tpu.memory_space<smem>>
    %24 = vector.broadcast %23 : f32 to vector<1x384xf32>
    %25 = arith.mulf %24, %14 : vector<1x384xf32>
    %26 = arith.addf %13, %25 : vector<1x384xf32>
    %27 = vector.extract_strided_slice %1 {offsets = [0, 1], sizes = [1, 384], strides = [1, 1]} : vector<1x896xf32> to vector<1x384xf32>
    %c1 = arith.constant 1 : index
    %28 = memref.load %arg1[%c1] : memref<57xf32, #tpu.memory_space<smem>>
    %29 = vector.broadcast %28 : f32 to vector<1x384xf32>
    %30 = arith.mulf %29, %27 : vector<1x384xf32>
    %31 = arith.addf %18, %30 : vector<1x384xf32>
    %c19 = arith.constant 19 : index
    %32 = memref.load %arg1[%c19] : memref<57xf32, #tpu.memory_space<smem>>
    %33 = vector.broadcast %32 : f32 to vector<1x384xf32>
    %34 = arith.mulf %33, %27 : vector<1x384xf32>
    %35 = arith.addf %22, %34 : vector<1x384xf32>
    %c37 = arith.constant 37 : index
    %36 = memref.load %arg1[%c37] : memref<57xf32, #tpu.memory_space<smem>>
    %37 = vector.broadcast %36 : f32 to vector<1x384xf32>
    %38 = arith.mulf %37, %27 : vector<1x384xf32>
    %39 = arith.addf %26, %38 : vector<1x384xf32>
    %40 = vector.extract_strided_slice %1 {offsets = [0, 2], sizes = [1, 384], strides = [1, 1]} : vector<1x896xf32> to vector<1x384xf32>
    %c2 = arith.constant 2 : index
    %41 = memref.load %arg1[%c2] : memref<57xf32, #tpu.memory_space<smem>>
    %42 = vector.broadcast %41 : f32 to vector<1x384xf32>
    %43 = arith.mulf %42, %40 : vector<1x384xf32>
    %44 = arith.addf %31, %43 : vector<1x384xf32>
    %c20 = arith.constant 20 : index
    %45 = memref.load %arg1[%c20] : memref<57xf32, #tpu.memory_space<smem>>
    %46 = vector.broadcast %45 : f32 to vector<1x384xf32>
    %47 = arith.mulf %46, %40 : vector<1x384xf32>
    %48 = arith.addf %35, %47 : vector<1x384xf32>
    %c38 = arith.constant 38 : index
    %49 = memref.load %arg1[%c38] : memref<57xf32, #tpu.memory_space<smem>>
    %50 = vector.broadcast %49 : f32 to vector<1x384xf32>
    %51 = arith.mulf %50, %40 : vector<1x384xf32>
    %52 = arith.addf %39, %51 : vector<1x384xf32>
    %53 = vector.extract_strided_slice %1 {offsets = [0, 19], sizes = [1, 384], strides = [1, 1]} : vector<1x896xf32> to vector<1x384xf32>
    %c3 = arith.constant 3 : index
    %54 = memref.load %arg1[%c3] : memref<57xf32, #tpu.memory_space<smem>>
    %55 = vector.broadcast %54 : f32 to vector<1x384xf32>
    %56 = arith.mulf %55, %53 : vector<1x384xf32>
    %57 = arith.addf %44, %56 : vector<1x384xf32>
    %c21 = arith.constant 21 : index
    %58 = memref.load %arg1[%c21] : memref<57xf32, #tpu.memory_space<smem>>
    %59 = vector.broadcast %58 : f32 to vector<1x384xf32>
    %60 = arith.mulf %59, %53 : vector<1x384xf32>
    %61 = arith.addf %48, %60 : vector<1x384xf32>
    %c39 = arith.constant 39 : index
    %62 = memref.load %arg1[%c39] : memref<57xf32, #tpu.memory_space<smem>>
    %63 = vector.broadcast %62 : f32 to vector<1x384xf32>
    %64 = arith.mulf %63, %53 : vector<1x384xf32>
    %65 = arith.addf %52, %64 : vector<1x384xf32>
    %66 = vector.extract_strided_slice %1 {offsets = [0, 20], sizes = [1, 384], strides = [1, 1]} : vector<1x896xf32> to vector<1x384xf32>
    %c4 = arith.constant 4 : index
    %67 = memref.load %arg1[%c4] : memref<57xf32, #tpu.memory_space<smem>>
    %68 = vector.broadcast %67 : f32 to vector<1x384xf32>
    %69 = arith.mulf %68, %66 : vector<1x384xf32>
    %70 = arith.addf %57, %69 : vector<1x384xf32>
    %c22 = arith.constant 22 : index
    %71 = memref.load %arg1[%c22] : memref<57xf32, #tpu.memory_space<smem>>
    %72 = vector.broadcast %71 : f32 to vector<1x384xf32>
    %73 = arith.mulf %72, %66 : vector<1x384xf32>
    %74 = arith.addf %61, %73 : vector<1x384xf32>
    %c40 = arith.constant 40 : index
    %75 = memref.load %arg1[%c40] : memref<57xf32, #tpu.memory_space<smem>>
    %76 = vector.broadcast %75 : f32 to vector<1x384xf32>
    %77 = arith.mulf %76, %66 : vector<1x384xf32>
    %78 = arith.addf %65, %77 : vector<1x384xf32>
    %79 = vector.extract_strided_slice %1 {offsets = [0, 21], sizes = [1, 384], strides = [1, 1]} : vector<1x896xf32> to vector<1x384xf32>
    %c5 = arith.constant 5 : index
    %80 = memref.load %arg1[%c5] : memref<57xf32, #tpu.memory_space<smem>>
    %81 = vector.broadcast %80 : f32 to vector<1x384xf32>
    %82 = arith.mulf %81, %79 : vector<1x384xf32>
    %83 = arith.addf %70, %82 : vector<1x384xf32>
    %c23 = arith.constant 23 : index
    %84 = memref.load %arg1[%c23] : memref<57xf32, #tpu.memory_space<smem>>
    %85 = vector.broadcast %84 : f32 to vector<1x384xf32>
    %86 = arith.mulf %85, %79 : vector<1x384xf32>
    %87 = arith.addf %74, %86 : vector<1x384xf32>
    %c41 = arith.constant 41 : index
    %88 = memref.load %arg1[%c41] : memref<57xf32, #tpu.memory_space<smem>>
    %89 = vector.broadcast %88 : f32 to vector<1x384xf32>
    %90 = arith.mulf %89, %79 : vector<1x384xf32>
    %91 = arith.addf %78, %90 : vector<1x384xf32>
    %92 = vector.extract_strided_slice %1 {offsets = [0, 38], sizes = [1, 384], strides = [1, 1]} : vector<1x896xf32> to vector<1x384xf32>
    %c6 = arith.constant 6 : index
    %93 = memref.load %arg1[%c6] : memref<57xf32, #tpu.memory_space<smem>>
    %94 = vector.broadcast %93 : f32 to vector<1x384xf32>
    %95 = arith.mulf %94, %92 : vector<1x384xf32>
    %96 = arith.addf %83, %95 : vector<1x384xf32>
    %c24 = arith.constant 24 : index
    %97 = memref.load %arg1[%c24] : memref<57xf32, #tpu.memory_space<smem>>
    %98 = vector.broadcast %97 : f32 to vector<1x384xf32>
    %99 = arith.mulf %98, %92 : vector<1x384xf32>
    %100 = arith.addf %87, %99 : vector<1x384xf32>
    %c42 = arith.constant 42 : index
    %101 = memref.load %arg1[%c42] : memref<57xf32, #tpu.memory_space<smem>>
    %102 = vector.broadcast %101 : f32 to vector<1x384xf32>
    %103 = arith.mulf %102, %92 : vector<1x384xf32>
    %104 = arith.addf %91, %103 : vector<1x384xf32>
    %105 = vector.extract_strided_slice %1 {offsets = [0, 39], sizes = [1, 384], strides = [1, 1]} : vector<1x896xf32> to vector<1x384xf32>
    %c7 = arith.constant 7 : index
    %106 = memref.load %arg1[%c7] : memref<57xf32, #tpu.memory_space<smem>>
    %107 = vector.broadcast %106 : f32 to vector<1x384xf32>
    %108 = arith.mulf %107, %105 : vector<1x384xf32>
    %109 = arith.addf %96, %108 : vector<1x384xf32>
    %c25 = arith.constant 25 : index
    %110 = memref.load %arg1[%c25] : memref<57xf32, #tpu.memory_space<smem>>
    %111 = vector.broadcast %110 : f32 to vector<1x384xf32>
    %112 = arith.mulf %111, %105 : vector<1x384xf32>
    %113 = arith.addf %100, %112 : vector<1x384xf32>
    %c43 = arith.constant 43 : index
    %114 = memref.load %arg1[%c43] : memref<57xf32, #tpu.memory_space<smem>>
    %115 = vector.broadcast %114 : f32 to vector<1x384xf32>
    %116 = arith.mulf %115, %105 : vector<1x384xf32>
    %117 = arith.addf %104, %116 : vector<1x384xf32>
    %118 = vector.extract_strided_slice %1 {offsets = [0, 40], sizes = [1, 384], strides = [1, 1]} : vector<1x896xf32> to vector<1x384xf32>
    %c8 = arith.constant 8 : index
    %119 = memref.load %arg1[%c8] : memref<57xf32, #tpu.memory_space<smem>>
    %120 = vector.broadcast %119 : f32 to vector<1x384xf32>
    %121 = arith.mulf %120, %118 : vector<1x384xf32>
    %122 = arith.addf %109, %121 : vector<1x384xf32>
    %c26 = arith.constant 26 : index
    %123 = memref.load %arg1[%c26] : memref<57xf32, #tpu.memory_space<smem>>
    %124 = vector.broadcast %123 : f32 to vector<1x384xf32>
    %125 = arith.mulf %124, %118 : vector<1x384xf32>
    %126 = arith.addf %113, %125 : vector<1x384xf32>
    %c44 = arith.constant 44 : index
    %127 = memref.load %arg1[%c44] : memref<57xf32, #tpu.memory_space<smem>>
    %128 = vector.broadcast %127 : f32 to vector<1x384xf32>
    %129 = arith.mulf %128, %118 : vector<1x384xf32>
    %130 = arith.addf %117, %129 : vector<1x384xf32>
    %131 = vector.extract_strided_slice %1 {offsets = [0, 361], sizes = [1, 384], strides = [1, 1]} : vector<1x896xf32> to vector<1x384xf32>
    %c9 = arith.constant 9 : index
    %132 = memref.load %arg1[%c9] : memref<57xf32, #tpu.memory_space<smem>>
    %133 = vector.broadcast %132 : f32 to vector<1x384xf32>
    %134 = arith.mulf %133, %131 : vector<1x384xf32>
    %135 = arith.addf %122, %134 : vector<1x384xf32>
    %c27 = arith.constant 27 : index
    %136 = memref.load %arg1[%c27] : memref<57xf32, #tpu.memory_space<smem>>
    %137 = vector.broadcast %136 : f32 to vector<1x384xf32>
    %138 = arith.mulf %137, %131 : vector<1x384xf32>
    %139 = arith.addf %126, %138 : vector<1x384xf32>
    %c45 = arith.constant 45 : index
    %140 = memref.load %arg1[%c45] : memref<57xf32, #tpu.memory_space<smem>>
    %141 = vector.broadcast %140 : f32 to vector<1x384xf32>
    %142 = arith.mulf %141, %131 : vector<1x384xf32>
    %143 = arith.addf %130, %142 : vector<1x384xf32>
    %144 = vector.extract_strided_slice %1 {offsets = [0, 362], sizes = [1, 384], strides = [1, 1]} : vector<1x896xf32> to vector<1x384xf32>
    %c10 = arith.constant 10 : index
    %145 = memref.load %arg1[%c10] : memref<57xf32, #tpu.memory_space<smem>>
    %146 = vector.broadcast %145 : f32 to vector<1x384xf32>
    %147 = arith.mulf %146, %144 : vector<1x384xf32>
    %148 = arith.addf %135, %147 : vector<1x384xf32>
    %c28 = arith.constant 28 : index
    %149 = memref.load %arg1[%c28] : memref<57xf32, #tpu.memory_space<smem>>
    %150 = vector.broadcast %149 : f32 to vector<1x384xf32>
    %151 = arith.mulf %150, %144 : vector<1x384xf32>
    %152 = arith.addf %139, %151 : vector<1x384xf32>
    %c46 = arith.constant 46 : index
    %153 = memref.load %arg1[%c46] : memref<57xf32, #tpu.memory_space<smem>>
    %154 = vector.broadcast %153 : f32 to vector<1x384xf32>
    %155 = arith.mulf %154, %144 : vector<1x384xf32>
    %156 = arith.addf %143, %155 : vector<1x384xf32>
    %157 = vector.extract_strided_slice %1 {offsets = [0, 363], sizes = [1, 384], strides = [1, 1]} : vector<1x896xf32> to vector<1x384xf32>
    %c11 = arith.constant 11 : index
    %158 = memref.load %arg1[%c11] : memref<57xf32, #tpu.memory_space<smem>>
    %159 = vector.broadcast %158 : f32 to vector<1x384xf32>
    %160 = arith.mulf %159, %157 : vector<1x384xf32>
    %161 = arith.addf %148, %160 : vector<1x384xf32>
    %c29 = arith.constant 29 : index
    %162 = memref.load %arg1[%c29] : memref<57xf32, #tpu.memory_space<smem>>
    %163 = vector.broadcast %162 : f32 to vector<1x384xf32>
    %164 = arith.mulf %163, %157 : vector<1x384xf32>
    %165 = arith.addf %152, %164 : vector<1x384xf32>
    %c47 = arith.constant 47 : index
    %166 = memref.load %arg1[%c47] : memref<57xf32, #tpu.memory_space<smem>>
    %167 = vector.broadcast %166 : f32 to vector<1x384xf32>
    %168 = arith.mulf %167, %157 : vector<1x384xf32>
    %169 = arith.addf %156, %168 : vector<1x384xf32>
    %170 = vector.extract_strided_slice %1 {offsets = [0, 380], sizes = [1, 384], strides = [1, 1]} : vector<1x896xf32> to vector<1x384xf32>
    %c12 = arith.constant 12 : index
    %171 = memref.load %arg1[%c12] : memref<57xf32, #tpu.memory_space<smem>>
    %172 = vector.broadcast %171 : f32 to vector<1x384xf32>
    %173 = arith.mulf %172, %170 : vector<1x384xf32>
    %174 = arith.addf %161, %173 : vector<1x384xf32>
    %c30 = arith.constant 30 : index
    %175 = memref.load %arg1[%c30] : memref<57xf32, #tpu.memory_space<smem>>
    %176 = vector.broadcast %175 : f32 to vector<1x384xf32>
    %177 = arith.mulf %176, %170 : vector<1x384xf32>
    %178 = arith.addf %165, %177 : vector<1x384xf32>
    %c48 = arith.constant 48 : index
    %179 = memref.load %arg1[%c48] : memref<57xf32, #tpu.memory_space<smem>>
    %180 = vector.broadcast %179 : f32 to vector<1x384xf32>
    %181 = arith.mulf %180, %170 : vector<1x384xf32>
    %182 = arith.addf %169, %181 : vector<1x384xf32>
    %183 = vector.extract_strided_slice %1 {offsets = [0, 381], sizes = [1, 384], strides = [1, 1]} : vector<1x896xf32> to vector<1x384xf32>
    %c13 = arith.constant 13 : index
    %184 = memref.load %arg1[%c13] : memref<57xf32, #tpu.memory_space<smem>>
    %185 = vector.broadcast %184 : f32 to vector<1x384xf32>
    %186 = arith.mulf %185, %183 : vector<1x384xf32>
    %187 = arith.addf %174, %186 : vector<1x384xf32>
    %c31 = arith.constant 31 : index
    %188 = memref.load %arg1[%c31] : memref<57xf32, #tpu.memory_space<smem>>
    %189 = vector.broadcast %188 : f32 to vector<1x384xf32>
    %190 = arith.mulf %189, %183 : vector<1x384xf32>
    %191 = arith.addf %178, %190 : vector<1x384xf32>
    %c49 = arith.constant 49 : index
    %192 = memref.load %arg1[%c49] : memref<57xf32, #tpu.memory_space<smem>>
    %193 = vector.broadcast %192 : f32 to vector<1x384xf32>
    %194 = arith.mulf %193, %183 : vector<1x384xf32>
    %195 = arith.addf %182, %194 : vector<1x384xf32>
    %196 = vector.extract_strided_slice %1 {offsets = [0, 382], sizes = [1, 384], strides = [1, 1]} : vector<1x896xf32> to vector<1x384xf32>
    %c14 = arith.constant 14 : index
    %197 = memref.load %arg1[%c14] : memref<57xf32, #tpu.memory_space<smem>>
    %198 = vector.broadcast %197 : f32 to vector<1x384xf32>
    %199 = arith.mulf %198, %196 : vector<1x384xf32>
    %200 = arith.addf %187, %199 : vector<1x384xf32>
    %c32 = arith.constant 32 : index
    %201 = memref.load %arg1[%c32] : memref<57xf32, #tpu.memory_space<smem>>
    %202 = vector.broadcast %201 : f32 to vector<1x384xf32>
    %203 = arith.mulf %202, %196 : vector<1x384xf32>
    %204 = arith.addf %191, %203 : vector<1x384xf32>
    %c50 = arith.constant 50 : index
    %205 = memref.load %arg1[%c50] : memref<57xf32, #tpu.memory_space<smem>>
    %206 = vector.broadcast %205 : f32 to vector<1x384xf32>
    %207 = arith.mulf %206, %196 : vector<1x384xf32>
    %208 = arith.addf %195, %207 : vector<1x384xf32>
    %209 = vector.extract_strided_slice %1 {offsets = [0, 399], sizes = [1, 384], strides = [1, 1]} : vector<1x896xf32> to vector<1x384xf32>
    %c15 = arith.constant 15 : index
    %210 = memref.load %arg1[%c15] : memref<57xf32, #tpu.memory_space<smem>>
    %211 = vector.broadcast %210 : f32 to vector<1x384xf32>
    %212 = arith.mulf %211, %209 : vector<1x384xf32>
    %213 = arith.addf %200, %212 : vector<1x384xf32>
    %c33 = arith.constant 33 : index
    %214 = memref.load %arg1[%c33] : memref<57xf32, #tpu.memory_space<smem>>
    %215 = vector.broadcast %214 : f32 to vector<1x384xf32>
    %216 = arith.mulf %215, %209 : vector<1x384xf32>
    %217 = arith.addf %204, %216 : vector<1x384xf32>
    %c51 = arith.constant 51 : index
    %218 = memref.load %arg1[%c51] : memref<57xf32, #tpu.memory_space<smem>>
    %219 = vector.broadcast %218 : f32 to vector<1x384xf32>
    %220 = arith.mulf %219, %209 : vector<1x384xf32>
    %221 = arith.addf %208, %220 : vector<1x384xf32>
    %222 = vector.extract_strided_slice %1 {offsets = [0, 400], sizes = [1, 384], strides = [1, 1]} : vector<1x896xf32> to vector<1x384xf32>
    %c16 = arith.constant 16 : index
    %223 = memref.load %arg1[%c16] : memref<57xf32, #tpu.memory_space<smem>>
    %224 = vector.broadcast %223 : f32 to vector<1x384xf32>
    %225 = arith.mulf %224, %222 : vector<1x384xf32>
    %226 = arith.addf %213, %225 : vector<1x384xf32>
    %c34 = arith.constant 34 : index
    %227 = memref.load %arg1[%c34] : memref<57xf32, #tpu.memory_space<smem>>
    %228 = vector.broadcast %227 : f32 to vector<1x384xf32>
    %229 = arith.mulf %228, %222 : vector<1x384xf32>
    %230 = arith.addf %217, %229 : vector<1x384xf32>
    %c52 = arith.constant 52 : index
    %231 = memref.load %arg1[%c52] : memref<57xf32, #tpu.memory_space<smem>>
    %232 = vector.broadcast %231 : f32 to vector<1x384xf32>
    %233 = arith.mulf %232, %222 : vector<1x384xf32>
    %234 = arith.addf %221, %233 : vector<1x384xf32>
    %235 = vector.extract_strided_slice %1 {offsets = [0, 401], sizes = [1, 384], strides = [1, 1]} : vector<1x896xf32> to vector<1x384xf32>
    %c17 = arith.constant 17 : index
    %236 = memref.load %arg1[%c17] : memref<57xf32, #tpu.memory_space<smem>>
    %237 = vector.broadcast %236 : f32 to vector<1x384xf32>
    %238 = arith.mulf %237, %235 : vector<1x384xf32>
    %239 = arith.addf %226, %238 : vector<1x384xf32>
    %c35 = arith.constant 35 : index
    %240 = memref.load %arg1[%c35] : memref<57xf32, #tpu.memory_space<smem>>
    %241 = vector.broadcast %240 : f32 to vector<1x384xf32>
    %242 = arith.mulf %241, %235 : vector<1x384xf32>
    %243 = arith.addf %230, %242 : vector<1x384xf32>
    %c53 = arith.constant 53 : index
    %244 = memref.load %arg1[%c53] : memref<57xf32, #tpu.memory_space<smem>>
    %245 = vector.broadcast %244 : f32 to vector<1x384xf32>
    %246 = arith.mulf %245, %235 : vector<1x384xf32>
    %247 = arith.addf %234, %246 : vector<1x384xf32>
    %248 = math.tanh %239 : vector<1x384xf32>
    %c0_5 = arith.constant 0 : index
    %c0_6 = arith.constant 0 : index
    %c0_7 = arith.constant 0 : index
    %c0_8 = arith.constant 0 : index
    %249 = vector.load %arg3[%c0_5, %c0_6, %c0_7, %c0_8] : memref<1x1x3x384xf32, #tpu.memory_space<vmem>>, vector<1x1x1x384xf32>
    %250 = vector.shape_cast %249 : vector<1x1x1x384xf32> to vector<1x384xf32>
    %251 = vector.shape_cast %248 : vector<1x384xf32> to vector<1x1x1x384xf32>
    tpu.vector_store %arg3[%c0_5, %c0_6, %c0_7, %c0_8], %251 {strides = array<i32>} : memref<1x1x3x384xf32, #tpu.memory_space<vmem>>, vector<1x1x1x384xf32>,
    %252 = math.tanh %243 : vector<1x384xf32>
    %c0_9 = arith.constant 0 : index
    %c0_10 = arith.constant 0 : index
    %c1_11 = arith.constant 1 : index
    %c0_12 = arith.constant 0 : index
    %253 = vector.load %arg3[%c0_9, %c0_10, %c1_11, %c0_12] : memref<1x1x3x384xf32, #tpu.memory_space<vmem>>, vector<1x1x1x384xf32>
    %254 = vector.shape_cast %253 : vector<1x1x1x384xf32> to vector<1x384xf32>
    %255 = vector.shape_cast %252 : vector<1x384xf32> to vector<1x1x1x384xf32>
    tpu.vector_store %arg3[%c0_9, %c0_10, %c1_11, %c0_12], %255 {strides = array<i32>} : memref<1x1x3x384xf32, #tpu.memory_space<vmem>>, vector<1x1x1x384xf32>,
    %256 = math.tanh %247 : vector<1x384xf32>
    %c0_13 = arith.constant 0 : index
    %c0_14 = arith.constant 0 : index
    %c2_15 = arith.constant 2 : index
    %c0_16 = arith.constant 0 : index
    %257 = vector.load %arg3[%c0_13, %c0_14, %c2_15, %c0_16] : memref<1x1x3x384xf32, #tpu.memory_space<vmem>>, vector<1x1x1x384xf32>
    %258 = vector.shape_cast %257 : vector<1x1x1x384xf32> to vector<1x384xf32>
    %259 = vector.shape_cast %256 : vector<1x384xf32> to vector<1x1x1x384xf32>
    tpu.vector_store %arg3[%c0_13, %c0_14, %c2_15, %c0_16], %259 {strides = array<i32>} : memref<1x1x3x384xf32, #tpu.memory_space<vmem>>, vector<1x1x1x384xf32>,
    return
  }
  func.func @transform_0(%arg0: i32) -> i32 {
    %c0_i32 = arith.constant 0 : i32
    %c0_i32_0 = arith.constant 0 : i32
    return %c0_i32 : i32
  }
  func.func @transform_1(%arg0: i32) -> (i32, i32, i32) {
    %c0_i32 = arith.constant 0 : i32
    %c0_i32_0 = arith.constant 0 : i32
    %c0_i32_1 = arith.constant 0 : i32
    return %arg0, %c0_i32, %c0_i32_0 : i32, i32, i32
  }
  func.func @transform_2(%arg0: i32) -> (i32, i32, i32, i32) {
    %c0_i32 = arith.constant 0 : i32
    %c0_i32_0 = arith.constant 0 : i32
    %c0_i32_1 = arith.constant 0 : i32
    %c0_i32_2 = arith.constant 0 : i32
    return %arg0, %c0_i32, %c0_i32_0, %c0_i32_1 : i32, i32, i32, i32
  }
}

</mosaic_0001>

<bundles_post_ra>
// kernel: conv_transpose2d_tanh.1
= control target key start
LH: loop header
LB: loop body
LE: loop exit
PB: predicated region body
PF: predicated region fallthrough
CT: control target
= control target key end

     0   :  { %7 = vsyncpa [#allocation3], 0  ;;  %s579_s12 = smov [#allocation2]   ;;  %s847_s0 = inlined_call_operand.vmem [shape: f32[57], index: 0, kind: input, shape index: {}]   ;;  %s848_s1 = inlined_call_operand.vmem [shape: f32[1,1,896], index: 1, kind: input, shape index: {}]   ;;  %s849_s2 = inlined_call_operand.vmem [shape: f32[1,1,3,384], index: 2, kind: output, shape index: {}]  }
   0x1   :  { %s13_s11 = sshll.u32 %s847_s0, 4  ;;  %s14_s11 = int_to_ptr.vmem [resolvable:$true] %s13_s11 }
   0x2   :  { %16 = dma.vmem_to_smem %s14_s11, 16, %s579_s12, [#allocation3]  }
   0x3   :  { %577 = dma.done.wait [#allocation3], 16  }
   0x4   :  { %578 = vsyncadd [#allocation3], 4294967280 }
   0x5   :  { %23 = sfence }
   0x6   :  { %s492_s13 = sld [smem:[#allocation2 + $0x14]]  ;;  %v618_v0 = vld [vmem:[%s848_s1] sm:$0xff]  ;;  %s580_s0 = smov 126   ;;  %vm53_vm0 = vcmask 1039360   ;;  %vm84_vm1 = vcmask 1031168   ;;  %vm115_vm2 = vcmask 891904  }
   0x7   :  { %s490_s14 = sld [smem:[#allocation2 + $0x25]]  ;;  %s581_s21 = smov 127   ;;  %vm146_vm3 = vcmask 883712   ;;  %vm177_vm4 = vcmask 875520   ;;  %vm208_vm5 = vcmask 736256   ;;  %vm239_vm6 = vcmask 728064  }
   0x8   :  { %s488_s15 = sld [smem:[#allocation2 + $0x1]]  ;;  %s582_s27 = smov 109   ;;  %vm270_vm7 = vcmask 719872   ;;  %vm339_vm8 = vcmask 171008   ;;  %vm301_vm9 = vcmask 187392   ;;  %vm320_vm10 = vcmask 179200  }
   0x9   :  { %s493_s16 = sld [smem:[#allocation2 + $0x26]]  ;;  %s583_s3 = smov 108   ;;  %vm396_vm11 = vcmask 15360   ;;  %vm358_vm12 = vcmask 31744   ;;  %vm377_vm13 = vcmask 23552   ;;  %vm415_vm14 = vcmask 924672  }
   0xa   :  { %s491_s19 = sld [smem:[#allocation2 + $0x2]]  ;;  %s584_s7 = smov 107   ;;  %vm434_vm15 = vcmask 916480  }
   0xb   :  { %s489_s20 = sld [smem:[#allocation2 + $0x13]]  ;;  %s585_s11 = smov 90  }
   0xc   :  { %v89_v1 = vstv %s492_s13  ;;  %s496_s22 = sld [smem:[#allocation2 + $0x27]]  ;;  %s588_s17 = smov 21  }
   0xd   :  { %v90_v2 = vmul.f32 %v89_v1, %v618_v0  ;;  %v68_v3 = vstv %s490_s14  ;;  %s495_s1 = sld [smem:[#allocation2 + $0x15]]  ;;  %s589_s18 = smov 22  }
   0xe   :  { %v69_v4 = vmul.f32 %v68_v3, %v618_v0  ;;  %v47_v5 = vstv %s488_s15  ;;  %s494_s23 = sld [smem:[#allocation2 + $0x3]]  ;;  %s586_s15 = smov 89  }
   0xf   :  { %92 = vrot.lane.b32.xlu2 %v90_v2, %s580_s0  ;;  %v48_v6 = vmul.f32 %v47_v5, %v618_v0  ;;  %v99_v7 = vstv %s493_s16  ;;  %s499_s24 = sld [smem:[#allocation2 + $0x28]]  ;;  %s587_s16 = smov 88  }
  0x10   :  { %71 = vrot.lane.b32.xlu1 %v69_v4, %s581_s21  ;;  %v78_v8 = vstv %s491_s19  ;;  %v100_v10 = vmul.f32 %v99_v7, %v618_v0  ;;  %s498_s25 = sld [smem:[#allocation2 + $0x16]]  ;;  %s590_s19 = smov 23  }
  0x11   :  { %50 = vrot.lane.b32.xlu0 %v48_v6, %s581_s21  ;;  %v58_v9 = vstv %s489_s20  ;;  %v79_v11 = vmul.f32 %v78_v8, %v618_v0  ;;  %s497_s26 = sld [smem:[#allocation2 + $0x4]]  ;;  %s591_s20 = smov 2  }
  0x12   :  { %v59_v12 = vmul.f32 %v58_v9, %v618_v0  ;;  %v130_v13 = vstv %s496_s22  ;;  %s502_s28 = sld [smem:[#allocation2 + $0x29]]  ;;  %s594_s22 = smov 111  }
  0x13   :  { %v120_v14 = vstv %s495_s1  ;;  %v131_v16 = vmul.f32 %v130_v13, %v618_v0  ;;  %s501_s29 = sld [smem:[#allocation2 + $0x17]]  ;;  %s595_s1 = smov 112  }
  0x14   :  { %v109_v15 = vstv %s494_s23  ;;  %v121_v17 = vmul.f32 %v120_v14, %v618_v0  ;;  %s500_s30 = sld [smem:[#allocation2 + $0x5]]  ;;  %s596_s23 = smov 113  }
  0x15   :  { %v110_v18 = vmul.f32 %v109_v15, %v618_v0  ;;  %v161_v19 = vstv %s499_s24  ;;  %s505_s4 = sld [smem:[#allocation2 + $0x2a]] }
  0x16   :  { %v151_v20 = vstv %s498_s25  ;;  %v162_v22 = vmul.f32 %v161_v19, %v618_v0  ;;  %s504_s5 = sld [smem:[#allocation2 + $0x18]] }
  0x17   :  { %102 = vrot.lane.b32.xlu2 %v100_v10, %s580_s0  ;;  %v140_v21 = vstv %s497_s26  ;;  %v152_v23 = vmul.f32 %v151_v20, %v618_v0  ;;  %s503_s6 = sld [smem:[#allocation2 + $0x6]] }
  0x18   :  { %81 = vrot.lane.b32.xlu1 %v79_v11, %s580_s0  ;;  %v141_v24 = vmul.f32 %v140_v21, %v618_v0  ;;  %v192_v25 = vstv %s502_s28  ;;  %s508_s8 = sld [smem:[#allocation2 + $0x2b]]  ;;  %s592_s0 = smov 3  }
  0x19   :  { %61 = vrot.lane.b32.xlu0 %v59_v12, %s581_s21  ;;  %v182_v26 = vstv %s501_s29  ;;  %v193_v28 = vmul.f32 %v192_v25, %v618_v0  ;;  %s507_s9 = sld [smem:[#allocation2 + $0x19]]  ;;  %s593_s21 = smov 4  }
  0x1a   :  { %v171_v27 = vstv %s500_s30  ;;  %v183_v29 = vmul.f32 %v182_v26, %v618_v0  ;;  %s506_s10 = sld [smem:[#allocation2 + $0x7]] }
  0x1b   :  { %v172_v30 = vmul.f32 %v171_v27, %v618_v0  ;;  %v223_v31 = vstv %s505_s4  ;;  %s511_s12 = sld [smem:[#allocation2 + $0x2c]] }
  0x1c   :  { %v213_v32 = vstv %s504_s5  ;;  %v224_v34 = vmul.f32 %v223_v31, %v618_v0  ;;  %s510_s13 = sld [smem:[#allocation2 + $0x1a]] }
  0x1d   :  { %v202_v33 = vstv %s503_s6  ;;  %v214_v35 = vmul.f32 %v213_v32, %v618_v0  ;;  %s509_s14 = sld [smem:[#allocation2 + $0x8]] }
  0x1e   :  { %v203_v36 = vmul.f32 %v202_v33, %v618_v0  ;;  %v254_v37 = vstv %s508_s8  ;;  %s487_s24 = sld [smem:[#allocation2 + $0x24]] }
  0x1f   :  { %133 = vrot.lane.b32.xlu2 %v131_v16, %s582_s27  ;;  %v244_v38 = vstv %s507_s9  ;;  %v255_v40 = vmul.f32 %v254_v37, %v618_v0  ;;  %s485_s25 = sld [smem:[#allocation2 + $0x38]] }
  0x20   :  { %123 = vrot.lane.b32.xlu1 %v121_v17, %s582_s27  ;;  %v233_v39 = vstv %s506_s10  ;;  %v245_v41 = vmul.f32 %v244_v38, %v618_v0  ;;  %s486_s26 = sld [smem:[#allocation2 + $0x12]] }
  0x21   :  { %112 = vrot.lane.b32.xlu0 %v110_v18, %s582_s27  ;;  %v234_v42 = vmul.f32 %v233_v39, %v618_v0  ;;  %v285_v43 = vstv %s511_s12  ;;  %s34_s27 = sld [smem:[#allocation2]] }
  0x22   :  { %v275_v44 = vstv %s510_s13  ;;  %v286_v46 = vmul.f32 %v285_v43, %v618_v0  ;;  %s484_s28 = sld [smem:[#allocation2 + $0x37]] }
  0x23   :  { %v264_v45 = vstv %s509_s14  ;;  %v276_v47 = vmul.f32 %v275_v44, %v618_v0  ;;  %s483_s29 = sld [smem:[#allocation2 + $0x36]] }
  0x24   :  { %v265_v48 = vmul.f32 %v264_v45, %v618_v0  ;;  %v43_v61 = vstv %s487_s24  ;;  %s689_s30 = sld [smem:[#allocation2 + $0x9]] }
  0x25   :  { %v44_v1 = vmul.f32 %v43_v61, %v618_v0  ;;  %v32_v2 = vstv %s485_s25  ;;  %s697_s4 = sld [smem:[#allocation2 + $0x2d]] }
  0x26   :  { %v39_v13 = vstv %s486_s26  ;;  %s703_s5 = sld [smem:[#allocation2 + $0xa]] }
  0x27   :  { %164 = vrot.lane.b32.xlu2 %v162_v22, %s583_s3  ;;  %v45_v4 = vadd.f32 %v44_v1, %v32_v2  ;;  %v35_v14 = vstv %s34_s27  ;;  %v40_v18 = vmul.f32 %v39_v13, %v618_v0  ;;  %s713_s6 = sld [smem:[#allocation2 + $0x1c]] }
  0x28   :  { %154 = vrot.lane.b32.xlu1 %v152_v23, %s583_s3  ;;  %v36_v19 = vmul.f32 %v35_v14, %v618_v0  ;;  %v29_v20 = vstv %s484_s28  ;;  %s725_s8 = sld [smem:[#allocation2 + $0xb]] }
  0x29   :  { %143 = vrot.lane.b32.xlu0 %v141_v24, %s583_s3  ;;  %v26_v23 = vstv %s483_s29  ;;  %s692_s3 = sld [smem:[#allocation2 + $0x1b]] }
  0x2a   :  { %v37_v32 = vadd.f32 %v36_v19, %v26_v23  ;;  %s727_s9 = sld [smem:[#allocation2 + $0x1d]]  ;;  %v295_v14 = vstv %s689_s30 }
  0x2b   :  { %s733_s10 = sld [smem:[#allocation2 + $0x2f]] }
  0x2c   :  { %s744_s12 = sld [smem:[#allocation2 + $0x1e]] }
  0x2d   :  { %s751_s13 = sld [smem:[#allocation2 + $0x30]] }
  0x2e   :  { %s754_s14 = sld [smem:[#allocation2 + $0xd]] }
  0x2f   :  { %195 = vrot.lane.b32.xlu2 %v193_v28, %s584_s7  ;;  %s816_s24 = sld [smem:[#allocation2 + $0x11]] }
  0x30   :  { %185 = vrot.lane.b32.xlu1 %v183_v29, %s584_s7  ;;  %s818_s25 = sld [smem:[#allocation2 + $0x23]] }
  0x31   :  { %174 = vrot.lane.b32.xlu0 %v172_v30, %s584_s7  ;;  %v41_v30 = vadd.f32 %v40_v18, %v29_v20  ;;  %s718_s7 = sld [smem:[#allocation2 + $0x2e]] }
  0x32   :  { %s823_s26 = sld [smem:[#allocation2 + $0x35]] }
  0x37   :  { %226 = vrot.lane.b32.xlu2 %v224_v34, %s585_s11 }
  0x38   :  { %216 = vrot.lane.b32.xlu1 %v214_v35, %s585_s11 }
  0x39   :  { %205 = vrot.lane.b32.xlu0 %v203_v36, %s585_s11  ;;  %s738_s11 = sld [smem:[#allocation2 + $0xc]] }
  0x3f   :  { %257 = vrot.lane.b32.xlu2 %v255_v40, %s586_s15 }
  0x40   :  { %247 = vrot.lane.b32.xlu1 %v245_v41, %s586_s15 }
  0x41   :  { %236 = vrot.lane.b32.xlu0 %v234_v42, %s586_s15  ;;  %s761_s15 = sld [smem:[#allocation2 + $0xe]] }
  0x47   :  { %288 = vrot.lane.b32.xlu2 %v286_v46, %s587_s16 }
  0x48   :  { %278 = vrot.lane.b32.xlu1 %v276_v47, %s587_s16 }
  0x49   :  { %267 = vrot.lane.b32.xlu0 %v265_v48, %s587_s16  ;;  %s766_s16 = sld [smem:[#allocation2 + $0x1f]] }
  0x4f   :  { %335 = vrot.lane.b32.xlu2 %v618_v0, %s588_s17  ;;  %s772_s17 = sld [smem:[#allocation2 + $0x31]] }
  0x50   :  { %316 = vrot.lane.b32.xlu1 %v618_v0, %s589_s18  ;;  %s779_s18 = sld [smem:[#allocation2 + $0x20]] }
  0x51   :  { %297 = vrot.lane.b32.xlu0 %v618_v0, %s590_s19  ;;  %s785_s19 = sld [smem:[#allocation2 + $0x32]] }
  0x57   :  { %392 = vrot.lane.b32.xlu2 %v618_v0, %s591_s20  ;;  %s788_s20 = sld [smem:[#allocation2 + $0xf]] }
  0x58   :  { %373 = vrot.lane.b32.xlu1 %v618_v0, %s592_s0  ;;  %s792_s0 = sld [smem:[#allocation2 + $0x21]] }
  0x59   :  { %354 = vrot.lane.b32.xlu0 %v618_v0, %s593_s21  ;;  %s797_s21 = sld [smem:[#allocation2 + $0x33]] }
  0x5f   :  { %449 = vrot.lane.b32.xlu2 %v618_v0, %s594_s22  ;;  %s805_s22 = sld [smem:[#allocation2 + $0x10]] }
  0x60   :  { %430 = vrot.lane.b32.xlu1 %v618_v0, %s595_s1  ;;  %s809_s1 = sld [smem:[#allocation2 + $0x22]] }
  0x61   :  { %411 = vrot.lane.b32.xlu0 %v618_v0, %s596_s23  ;;  %s814_s23 = sld [smem:[#allocation2 + $0x34]] }
  0x69   :  { %v653_v49 = vpop.permute.xlu2 %92 }
  0x6a   :  { %v94_v31 = vrot.slane %v653_v49, 1 }
  0x6c   :  { %v95_v42 = vsel %vm84_vm1, %v653_v49, %v94_v31 }
  0x71   :  { %v103_v50 = vpop.permute.xlu2 %102 }
  0x72   :  { %v104_v5 = vrot.slane %v103_v50, 1 }
  0x74   :  { %v105_v11 = vsel %vm84_vm1, %v103_v50, %v104_v5 }
  0x79   :  { %v134_v51 = vpop.permute.xlu2 %133 }
  0x7a   :  { %v135_v12 = vrot.slane %v134_v51, 1 }
  0x7c   :  { %v136_v16 = vsel %vm115_vm2, %v134_v51, %v135_v12 }
  0x81   :  { %v165_v54 = vpop.permute.xlu2 %164 }
  0x82   :  { %v72_v52 = vpop.permute.xlu1 %71  ;;  %v166_v17 = vrot.slane %v165_v54, 1 }
  0x83   :  { %v51_v53 = vpop.permute.xlu0 %50  ;;  %v73_v3 = vrot.slane %v72_v52, 1 }
  0x84   :  { %v52_v24 = vrot.slane %v51_v53, 1  ;;  %v167_v28 = vsel %vm146_vm3, %v165_v54, %v166_v17  ;;  %v311_v17 = vstv %s697_s4 }
  0x85   :  { %v74_v6 = vsel %vm53_vm0, %v72_v52, %v73_v3 }
  0x86   :  { %v76_v10 = vadd.f32 %v74_v6, %v45_v4  ;;  %v54_v33 = vsel %vm53_vm0, %v51_v53, %v52_v24  ;;  %v334_v24 = vstv %s725_s8 }
  0x87   :  { %v56_v43 = vadd.f32 %v54_v33, %v37_v32  ;;  %v349_v33 = vstv %s733_s10 }
  0x88   :  { %v107_v15 = vadd.f32 %v105_v11, %v76_v10 }
  0x89   :  { %v196_v57 = vpop.permute.xlu2 %195 }
  0x8a   :  { %v655_v55 = vpop.permute.xlu1 %81  ;;  %v138_v26 = vadd.f32 %v136_v16, %v107_v15  ;;  %v197_v29 = vrot.slane %v196_v57, 1 }
  0x8b   :  { %v62_v56 = vpop.permute.xlu0 %61  ;;  %v83_v34 = vrot.slane %v655_v55, 1 }
  0x8c   :  { %v63_v21 = vrot.slane %v62_v56, 1  ;;  %v169_v36 = vadd.f32 %v167_v28, %v138_v26  ;;  %v198_v38 = vsel %vm177_vm4, %v196_v57, %v197_v29  ;;  %v315_v28 = vstv %s703_s5 }
  0x8d   :  { %v85_v45 = vsel %vm84_vm1, %v655_v55, %v83_v34  ;;  %v326_v29 = vstv %s713_s6 }
  0x8e   :  { %v64_v0 = vsel %vm53_vm0, %v62_v56, %v63_v21  ;;  %v200_v49 = vadd.f32 %v198_v38, %v169_v36  ;;  %v87_v61 = vadd.f32 %v85_v45, %v56_v43  ;;  %vm453_vm0 = vcmask 908288  }
  0x8f   :  { %v66_v39 = vadd.f32 %v64_v0, %v41_v30  ;;  %v345_v30 = vstv %s727_s9 }
  0x91   :  { %v661_v60 = vpop.permute.xlu2 %226  ;;  %v97_v55 = vadd.f32 %v95_v42, %v66_v39 }
  0x92   :  { %v657_v58 = vpop.permute.xlu1 %123  ;;  %v228_v35 = vrot.slane %v661_v60, 1 }
  0x93   :  { %v659_v59 = vpop.permute.xlu0 %112  ;;  %v125_v37 = vrot.slane %v657_v58, 1 }
  0x94   :  { %v114_v40 = vrot.slane %v659_v59, 1  ;;  %v229_v46 = vsel %vm208_vm5, %v661_v60, %v228_v35 }
  0x95   :  { %v126_v51 = vsel %vm115_vm2, %v657_v58, %v125_v37  ;;  %v231_v1 = vadd.f32 %v229_v46, %v200_v49  ;;  %v353_v37 = vstv %s738_s11 }
  0x96   :  { %v116_v56 = vsel %vm115_vm2, %v659_v59, %v114_v40  ;;  %v128_v58 = vadd.f32 %v126_v51, %v97_v55 }
  0x97   :  { %v118_v59 = vadd.f32 %v116_v56, %v87_v61  ;;  %v391_v56 = vstv %s761_s15 }
  0x99   :  { %v669_v7 = vpop.permute.xlu2 %257 }
  0x9a   :  { %v663_v62 = vpop.permute.xlu1 %154  ;;  %v259_v41 = vrot.slane %v669_v7, 1 }
  0x9b   :  { %v665_v63 = vpop.permute.xlu0 %143  ;;  %v156_v47 = vrot.slane %v663_v62, 1 }
  0x9c   :  { %v145_v48 = vrot.slane %v665_v63, 1  ;;  %v260_v57 = vsel %vm239_vm6, %v669_v7, %v259_v41 }
  0x9d   :  { %v157_v2 = vsel %vm146_vm3, %v663_v62, %v156_v47  ;;  %v262_v4 = vadd.f32 %v260_v57, %v231_v1 }
  0x9e   :  { %v147_v3 = vsel %vm146_vm3, %v665_v63, %v145_v48  ;;  %v159_v11 = vadd.f32 %v157_v2, %v128_v58 }
  0x9f   :  { %v149_v12 = vadd.f32 %v147_v3, %v118_v59 }
  0xa1   :  { %v289_v27 = vpop.permute.xlu2 %288 }
  0xa2   :  { %v671_v8 = vpop.permute.xlu1 %185  ;;  %v290_v52 = vrot.slane %v289_v27, 1 }
  0xa3   :  { %v673_v9 = vpop.permute.xlu0 %174  ;;  %v187_v53 = vrot.slane %v671_v8, 1 }
  0xa4   :  { %v176_v60 = vrot.slane %v673_v9, 1  ;;  %v291_v5 = vsel %vm270_vm7, %v289_v27, %v290_v52 }
  0xa5   :  { %v188_v6 = vsel %vm177_vm4, %v671_v8, %v187_v53  ;;  %v746_v8 = vadd.f32 %v291_v5, %v262_v4  ;;  %v364_v53 = vstv %s744_s12  ;;  %v368_v5 = vstv %s751_s13 }
  0xa6   :  { %v178_v7 = vsel %vm177_vm4, %v673_v9, %v176_v60  ;;  %v307_v9 = vstv %s692_s3  ;;  %v190_v18 = vadd.f32 %v188_v6, %v159_v11  ;;  %v372_v6 = vstv %s754_s14 }
  0xa7   :  { %v180_v19 = vadd.f32 %v178_v7, %v149_v12  ;;  %v383_v7 = vstv %s766_s16  ;;  %v402_v11 = vstv %s779_s18  ;;  %v387_v12 = vstv %s772_s17 }
  0xa9   :  { %v336_v54 = vpop.permute.xlu2 %335 }
  0xaa   :  { %v679_v22 = vpop.permute.xlu1 %216  ;;  %v337_v10 = vrot.slane %v336_v54, 2  ;;  %v338_v63 = vrot.slane %v336_v54, 3 }
  0xab   :  { %v681_v25 = vpop.permute.xlu0 %205  ;;  %v218_v62 = vrot.slane %v679_v22, 1 }
  0xac   :  { %v207_v15 = vrot.slane %v681_v25, 1  ;;  %v340_v26 = vsel %vm339_vm8, %v337_v10, %v338_v63 }
  0xad   :  { %v219_v21 = vsel %vm208_vm5, %v679_v22, %v218_v62  ;;  %v330_v22 = vstv %s718_s7  ;;  %v776_v36 = vmul.f32 %v340_v26, %v334_v24  ;;  %v783_v39 = vmul.f32 %v345_v30, %v340_v26 }
  0xae   :  { %v209_v32 = vsel %vm208_vm5, %v681_v25, %v207_v15  ;;  %v221_v34 = vadd.f32 %v219_v21, %v190_v18 }
  0xaf   :  { %v211_v41 = vadd.f32 %v209_v32, %v180_v19 }
  0xb1   :  { %v393_v31 = vpop.permute.xlu2 %392 }
  0xb2   :  { %v701_v44 = vpop.permute.xlu1 %247  ;;  %v394_v25 = vrot.slane %v393_v31, 2  ;;  %v395_v40 = vrot.slane %v393_v31, 3 }
  0xb3   :  { %v711_v50 = vpop.permute.xlu0 %236  ;;  %v249_v20 = vrot.slane %v701_v44, 1 }
  0xb4   :  { %v238_v23 = vrot.slane %v711_v50, 1  ;;  %v397_v57 = vsel %vm396_vm11, %v394_v25, %v395_v40  ;;  %v429_v40 = vstv %s805_s22 }
  0xb5   :  { %v250_v35 = vsel %vm239_vm6, %v701_v44, %v249_v20  ;;  %v350_v44 = vmul.f32 %v349_v33, %v340_v26  ;;  %v399_v15 = vmul.f32 %v397_v57, %v391_v56  ;;  %v403_v24 = vmul.f32 %v402_v11, %v397_v57 }
  0xb6   :  { %v240_v38 = vsel %vm239_vm6, %v711_v50, %v238_v23  ;;  %v252_v45 = vadd.f32 %v250_v35, %v221_v34 }
  0xb7   :  { %v242_v49 = vadd.f32 %v240_v38, %v211_v41 }
  0xb9   :  { %v450_v30 = vpop.permute.xlu2 %449 }
  0xba   :  { %v279_v13 = vpop.permute.xlu1 %278  ;;  %v451_v41 = vrot.slane %v450_v30, 3 }
  0xbb   :  { %v268_v16 = vpop.permute.xlu0 %267  ;;  %v280_v27 = vrot.slane %v279_v13, 1 }
  0xbc   :  { %v269_v0 = vrot.slane %v268_v16, 1 }
  0xbd   :  { %v281_v42 = vsel %vm270_vm7, %v279_v13, %v280_v27 }
  0xbe   :  { %v271_v46 = vsel %vm270_vm7, %v268_v16, %v269_v0  ;;  %v283_v54 = vadd.f32 %v281_v42, %v252_v45  ;;  %v410_v16 = vstv %s788_s20  ;;  %v440_v45 = vstv %s809_s1 }
  0xbf   :  { %v273_v60 = vadd.f32 %v271_v46, %v242_v49  ;;  %v444_v46 = vstv %s814_s23 }
  0xc2   :  { %v317_v43 = vpop.permute.xlu1 %316 }
  0xc3   :  { %v298_v47 = vpop.permute.xlu0 %297  ;;  %v318_v48 = vrot.slane %v317_v43, 2  ;;  %v319_v50 = vrot.slane %v317_v43, 3 }
  0xc4   :  { %v299_v51 = vrot.slane %v298_v47, 2  ;;  %v300_v52 = vrot.slane %v298_v47, 3 }
  0xc5   :  { %v321_v55 = vsel %vm320_vm10, %v318_v48, %v319_v50 }
  0xc6   :  { %v302_v61 = vsel %vm301_vm9, %v299_v51, %v300_v52  ;;  %v323_v1 = vmul.f32 %v321_v55, %v315_v28  ;;  %v327_v58 = vmul.f32 %v326_v29, %v321_v55  ;;  %v331_v4 = vmul.f32 %v330_v22, %v321_v55 }
  0xc7   :  { %v304_v2 = vmul.f32 %v302_v61, %v295_v14  ;;  %v308_v3 = vmul.f32 %v307_v9, %v302_v61  ;;  %v312_v59 = vmul.f32 %v311_v17, %v302_v61  ;;  %v406_v14 = vstv %s785_s19 }
  0xc8   :  { %v407_v27 = vmul.f32 %v406_v14, %v397_v57  ;;  %v421_v28 = vstv %s792_s0  ;;  %v425_v29 = vstv %s797_s21  ;;  %v448_v55 = vstv %s816_s24 }
  0xc9   :  { %v305_v62 = vadd.f32 %v304_v2, %v273_v60  ;;  %v309_v10 = vadd.f32 %v308_v3, %v283_v54  ;;  %v313_v63 = vadd.f32 %v312_v59, %v746_v8  ;;  %v459_v57 = vstv %s818_s25 }
  0xca   :  { %v374_v13 = vpop.permute.xlu1 %373  ;;  %v463_v60 = vstv %s823_s26 }
  0xcb   :  { %v324_v9 = vadd.f32 %v323_v1, %v305_v62  ;;  %v328_v17 = vadd.f32 %v327_v58, %v309_v10  ;;  %v332_v18 = vadd.f32 %v331_v4, %v313_v63  ;;  %v355_v19 = vpop.permute.xlu0 %354  ;;  %v375_v20 = vrot.slane %v374_v13, 2 }
  0xcc   :  { %v356_v8 = vrot.slane %v355_v19, 2  ;;  %v357_v21 = vrot.slane %v355_v19, 3  ;;  %v376_v23 = vrot.slane %v374_v13, 3 }
  0xcd   :  { %v343_v26 = vadd.f32 %v776_v36, %v324_v9  ;;  %v347_v31 = vadd.f32 %v783_v39, %v328_v17  ;;  %v351_v32 = vadd.f32 %v350_v44, %v332_v18  ;;  %v452_v44 = vrot.slane %v450_v30, 4 }
  0xce   :  { %v359_v0 = vsel %vm358_vm12, %v356_v8, %v357_v21  ;;  %v378_v22 = vsel %vm377_vm13, %v375_v20, %v376_v23  ;;  %v467_v8 = vlaneseq }
  0xcf   :  { %v361_v33 = vmul.f32 %v359_v0, %v353_v37  ;;  %v365_v34 = vmul.f32 %v364_v53, %v359_v0  ;;  %v369_v35 = vmul.f32 %v368_v5, %v359_v0  ;;  %v380_v36 = vmul.f32 %v378_v22, %v372_v6 }
  0xd0   :  { %v384_v38 = vmul.f32 %v383_v7, %v378_v22  ;;  %v388_v25 = vmul.f32 %v387_v12, %v378_v22  ;;  %v454_v61 = vsel %vm453_vm0, %v451_v41, %v452_v44  ;;  %vm469_vm1 = vcmp.lt.s32.totalorder %v467_v8, 384 }
  0xd1   :  { %v362_v42 = vadd.f32 %v361_v33, %v343_v26  ;;  %v366_v43 = vadd.f32 %v365_v34, %v347_v31  ;;  %v370_v39 = vadd.f32 %v369_v35, %v351_v32  ;;  %v456_v10 = vmul.f32 %v454_v61, %v448_v55 }
  0xd2   :  { %v431_v47 = vpop.permute.xlu1 %430  ;;  %v460_v63 = vmul.f32 %v459_v57, %v454_v61  ;;  %v464_v14 = vmul.f32 %v463_v60, %v454_v61 }
  0xd3   :  { %v381_v37 = vadd.f32 %v380_v36, %v362_v42  ;;  %v385_v48 = vadd.f32 %v384_v38, %v366_v43  ;;  %v389_v50 = vadd.f32 %v388_v25, %v370_v39  ;;  %v412_v49 = vpop.permute.xlu0 %411  ;;  %v432_v51 = vrot.slane %v431_v47, 3 }
  0xd4   :  { %v413_v52 = vrot.slane %v412_v49, 3  ;;  %v414_v53 = vrot.slane %v412_v49, 4  ;;  %v433_v54 = vrot.slane %v431_v47, 4 }
  0xd5   :  { %v400_v56 = vadd.f32 %v399_v15, %v381_v37  ;;  %v404_v1 = vadd.f32 %v403_v24, %v385_v48  ;;  %v408_v58 = vadd.f32 %v407_v27, %v389_v50 }
  0xd6   :  { %v416_v2 = vsel %vm415_vm14, %v413_v52, %v414_v53  ;;  %v435_v3 = vsel %vm434_vm15, %v432_v51, %v433_v54 }
  0xd7   :  { %v418_v59 = vmul.f32 %v416_v2, %v410_v16  ;;  %v422_v4 = vmul.f32 %v421_v28, %v416_v2  ;;  %v426_v5 = vmul.f32 %v425_v29, %v416_v2  ;;  %v437_v6 = vmul.f32 %v435_v3, %v429_v40 }
  0xd8   :  { %v441_v7 = vmul.f32 %v440_v45, %v435_v3  ;;  %v445_v62 = vmul.f32 %v444_v46, %v435_v3 }
  0xd9   :  { %v419_v11 = vadd.f32 %v418_v59, %v400_v56  ;;  %v423_v12 = vadd.f32 %v422_v4, %v404_v1  ;;  %v427_v13 = vadd.f32 %v426_v5, %v408_v58 }
  0xdb   :  { %v438_v15 = vadd.f32 %v437_v6, %v419_v11  ;;  %v442_v9 = vadd.f32 %v441_v7, %v423_v12  ;;  %v446_v17 = vadd.f32 %v445_v62, %v427_v13 }
  0xdd   :  { %v457_v18 = vadd.f32 %v456_v10, %v438_v15  ;;  %v461_v19 = vadd.f32 %v460_v63, %v442_v9  ;;  %v465_v20 = vadd.f32 %v464_v14, %v446_v17 }
  0xdf   :  { %559 = vtanh.f32 %v457_v18 }
  0xe0   :  { %561 = vtanh.f32 %v461_v19 }
  0xe1   :  { %563 = vtanh.f32 %v465_v20 }
  0xe5   :  { %v560_v16 = vpop.eup %559 }
  0xe6   :  { %v562_v21 = vpop.eup %561  ;;  %471 = vst.msk [vmem:[%s849_s2] ss:$4 sm:$0x7] %vm469_vm1, %v560_v16 }
  0xe7   :  { %v564_v23 = vpop.eup %563  ;;  %539 = vst.msk [vmem:[%s849_s2 + $0x1] ss:$4 sm:$0x7] %vm469_vm1, %v562_v21 }
  0xe8   :  { %540 = vst.msk [vmem:[%s849_s2 + $0x2] ss:$4 sm:$0x7] %vm469_vm1, %v564_v23 }
  0xe9   :  { %482 = vsyncpa [#allocation3], 1 }

</bundles_post_ra>
